<compile_context>
chip_gen: v7x
topology: tpu7x:2x2x1
jax: 0.10.0
libtpu: 0.0.40
codegen_flags: <defaults>
</compile_context>

<pallas_src>
import jax
import jax.numpy as jnp
from jax.experimental import pallas as pl
from jax.experimental.pallas import tpu as pltpu


_LANE = 128
_TARGET_BLOCK_BYTES = 4 * 1024 * 1024     # ~4 MiB/block -> ~16 MiB double-buffered in+out
_MIN_BLOCK_BYTES = 512 * 1024             # grow B_TILE until a block is at least this big
_VMEM_LIMIT_BYTES = 48 << 20              # > scoped defaults, < v7x 64 MiB physical


def mean_norm_kernel(x_ref, o_ref):
    # x_ref block: (B_TILE, T, F_TILE). Reduce over axis -2 (sublane axis),
    # broadcast-subtract, all on-chip. Accumulate in f32, cast back on store.
    x = x_ref[...]
    inv_t = 1.0 / x.shape[-2]                              # compile-time constant
    xf = x.astype(jnp.float32)
    mean = jnp.sum(xf, axis=-2, keepdims=True) * inv_t     # (B_TILE, 1, F_TILE)
    o_ref[...] = (xf - mean).astype(o_ref.dtype)


def _choose_f_tile(T, F, itemsize):
    """Largest multiple-of-128 divisor of F whose (T, f_tile) slab fits the budget."""
    if F % _LANE != 0:
        # Small / ragged feature dim: must use the full extent (Pallas (8,128) rule).
        return F
    best = _LANE
    cand = _LANE
    while cand <= F:
        if F % cand == 0 and T * cand * itemsize <= _TARGET_BLOCK_BYTES:
            best = cand
        cand += _LANE
    return best
    # TODO(synk): if T alone is huge (T*128*itemsize >> budget) T would also need
    # tiling with a two-pass/accumulator scheme; not needed for these shapes.


def _choose_b_tile(B, T, f_tile, itemsize):
    """Batch multiple B per block when a single (1, T, f_tile) slab is tiny."""
    block_bytes = T * f_tile * itemsize
    if block_bytes >= _MIN_BLOCK_BYTES:
        return 1
    b_tile = 1
    for cand in range(1, B + 1):
        if B % cand != 0:
            continue
        if cand * block_bytes <= _TARGET_BLOCK_BYTES:
            b_tile = cand
        if cand * block_bytes >= _MIN_BLOCK_BYTES:
            break
    return b_tile


def mean_norm(x):
    """x: (B, T, F) array. Returns x - mean(x, axis=-2, keepdims=True)."""
    B, T, F = x.shape
    itemsize = jnp.dtype(x.dtype).itemsize

    f_tile = _choose_f_tile(T, F, itemsize)
    b_tile = _choose_b_tile(B, T, f_tile, itemsize)

    grid = (B // b_tile, F // f_tile)
    block = (b_tile, T, f_tile)

    return pl.pallas_call(
        mean_norm_kernel,
        out_shape=jax.ShapeDtypeStruct((B, T, F), x.dtype),
        grid_spec=pl.GridSpec(
            grid=grid,
            in_specs=[pl.BlockSpec(block, lambda b, f: (b, 0, f))],
            out_specs=pl.BlockSpec(block, lambda b, f: (b, 0, f)),
        ),
        compiler_params=pltpu.CompilerParams(
            dimension_semantics=("parallel", "parallel"),
            vmem_limit_bytes=_VMEM_LIMIT_BYTES,
        ),
    )(x)


def _reference(x):
    return x - jnp.mean(x, axis=-2, keepdims=True)


if __name__ == "__main__":
    key = jax.random.PRNGKey(0)

    # Case 1: module-like small shape (small F -> full-F block, B batched per block).
    B, T, F = 2, 16, 32
    x1 = jax.random.normal(key, (B, T, F), dtype=jnp.float32)
    out1 = jax.block_until_ready(mean_norm(x1))
    ref1 = _reference(x1)
    assert out1.shape == ref1.shape
    assert jnp.allclose(out1, ref1, atol=1e-6, rtol=1e-6)

    # Case 2: lane-dense feature dim exercises the F-tiling path.
    k2 = jax.random.PRNGKey(1)
    x2 = jax.random.normal(k2, (4, 32, 256), dtype=jnp.float32)
    out2 = jax.block_until_ready(mean_norm(x2))
    ref2 = _reference(x2)
    assert out2.shape == ref2.shape
    assert jnp.allclose(out2, ref2, atol=1e-6, rtol=1e-6)

    print("KERNEL_OK")
</pallas_src>

<mosaic_0001>
module attributes {stable_mosaic.version = 11 : i64} {
  func.func @mean_norm_kernel(%arg0: i32, %arg1: i32, %arg2: memref<2x16x32xf32, #tpu.memory_space<vmem>>, %arg3: memref<2x16x32xf32, #tpu.memory_space<vmem>>) attributes {dimension_semantics = [#tpu.dimension_semantics<parallel>, #tpu.dimension_semantics<parallel>], iteration_bounds = array<i64: 1, 1>, scalar_prefetch = 0 : i64, scratch_operands = 0 : i64, tpu.core_type = #tpu.core_type<tc>, window_params = [{transform_indices = @transform_0, window_bounds = array<i64: 2, 16, 32>}, {transform_indices = @transform_1, window_bounds = array<i64: 2, 16, 32>}]} {
    %c0 = arith.constant 0 : index
    %c0_0 = arith.constant 0 : index
    %c0_1 = arith.constant 0 : index
    %0 = vector.load %arg2[%c0, %c0_0, %c0_1] : memref<2x16x32xf32, #tpu.memory_space<vmem>>, vector<2x16x32xf32>
    %cst = arith.constant dense<0.000000e+00> : vector<2x32xf32>
    %1 = vector.multi_reduction <add>, %0, %cst [1] : vector<2x16x32xf32> to vector<2x32xf32>
    %2 = vector.shape_cast %1 : vector<2x32xf32> to vector<2x1x32xf32>
    %cst_2 = arith.constant 6.250000e-02 : f32
    %3 = vector.broadcast %cst_2 : f32 to vector<2x1x32xf32>
    %4 = arith.mulf %2, %3 : vector<2x1x32xf32>
    %5 = vector.broadcast %4 : vector<2x1x32xf32> to vector<2x16x32xf32>
    %6 = arith.subf %0, %5 : vector<2x16x32xf32>
    %c0_3 = arith.constant 0 : index
    %c0_4 = arith.constant 0 : index
    %c0_5 = arith.constant 0 : index
    %7 = vector.load %arg3[%c0_3, %c0_4, %c0_5] : memref<2x16x32xf32, #tpu.memory_space<vmem>>, vector<2x16x32xf32>
    tpu.vector_store %arg3[%c0_3, %c0_4, %c0_5], %6 {strides = array<i32>} : memref<2x16x32xf32, #tpu.memory_space<vmem>>, vector<2x16x32xf32>,
    return
  }
  func.func @transform_0(%arg0: i32, %arg1: i32) -> (i32, i32, i32) {
    %c0_i32 = arith.constant 0 : i32
    %c0_i32_0 = arith.constant 0 : i32
    return %arg0, %c0_i32, %arg1 : i32, i32, i32
  }
  func.func @transform_1(%arg0: i32, %arg1: i32) -> (i32, i32, i32) {
    %c0_i32 = arith.constant 0 : i32
    %c0_i32_0 = arith.constant 0 : i32
    return %arg0, %c0_i32, %arg1 : i32, i32, i32
  }
}

</mosaic_0001>

<bundles_post_ra>
// kernel: tpu_custom_call.1
= control target key start
LH: loop header
LB: loop body
LE: loop exit
PB: predicated region body
PF: predicated region fallthrough
CT: control target
= control target key end

     0   :  { %6 = vsyncpa [#allocation3], 0  ;;  %s177_s0 = inlined_call_operand.hbm [shape: f32[2,16,32], index: 0, kind: input, shape index: {}]   ;;  %s178_s1 = inlined_call_operand.hbm [shape: f32[2,16,32], index: 1, kind: output, shape index: {}]  }
   0x1   :  { %7 = vsyncpa [#allocation4], 0  ;;  %s125_s6 = smov [#allocation2]   ;;  %s77_s10 = scalar_lea.hbm %s177_s0, 512 }
   0x2   :  { %s13_s7 = sshll.u32 %s125_s6, 4  ;;  %p78_p0 = scmp.ne.s32.totalorder %s177_s0, %s77_s10  ;;  %s14_s7 = int_to_ptr.vmem [resolvable:$true] %s13_s7 }
   0x3   :  { %p81_p1 = scmp.lt.u32.totalorder %s77_s10, %s177_s0 }
   0x5   :  { %p83_p2 = pnand %p81_p1, %p78_p0 }
   0x7   :  { %86 = shalt.err (!%p83_p2)
}
   0x8   :  { %s87_s15 = scalar_lea.vmem %s14_s7, 512  ;;  %p92_p4 = scmp.lt.s32.totalorder %s14_s7, %s14_s7 }
   0x9   :  { %p88_p3 = scmp.ne.s32.totalorder %s14_s7, %s87_s15  ;;  %p93_p5 = scmp.lt.s32.totalorder %s87_s15, %s87_s15 }
   0xb   :  { %p94_p6 = por %p93_p5, %p92_p4 }
   0xd   :  { %p95_p7 = pnand %p94_p6, %p88_p3 }
   0xf   :  { %98 = shalt.err (!%p95_p7)
}
  0x10   :  { %s126_s16 = smov 128   ;;  %s127_s17 = smov 8  }
  0x11   :  { %19 = dma.hbm_to_vmem [thread:$0]  %s177_s0, 512, %s14_s7, [#allocation3], %s126_s16, %s126_s16, %s127_s17  }
  0x12   :  { %121 = dma.done.wait [#allocation3], 512  }
  0x13   :  { %122 = vsyncadd [#allocation3], 4294966784  ;;  %vm27_vm0 = vcmask 261120   ;;  %v23_v0 = vld [vmem:[#allocation2] sm:$0xff]  ;;  %v24_v1 = vld [vmem:[#allocation2 + $0x8] sm:$0xff]  ;;  %s128_s0 = smov [#allocation5]  }
  0x14   :  { %v25_v2 = vld [vmem:[#allocation2 + $0x10] sm:$0xff]  ;;  %v28_v3 = vsel %vm27_vm0, %v23_v0, 0.0  ;;  %v29_v4 = vsel %vm27_vm0, %v24_v1, 0.0  ;;  %v26_v5 = vld [vmem:[#allocation2 + $0x18] sm:$0xff]  ;;  %s61_s20 = sshll.u32 %s128_s0, 4  ;;  %s62_s20 = int_to_ptr.vmem [resolvable:$true] %s61_s20 }
  0x15   :  { %v37_v6 = vsel %vm27_vm0, %v25_v2, 0.0  ;;  %v30_v7 = vadd.f32 %v29_v4, %v28_v3  ;;  %v38_v8 = vsel %vm27_vm0, %v26_v5, 0.0  ;;  %s99_s21 = scalar_lea.vmem %s62_s20, 512  ;;  %p104_p9 = scmp.lt.s32.totalorder %s62_s20, %s62_s20 }
  0x16   :  { %v39_v9 = vadd.f32 %v38_v8, %v37_v6  ;;  %p100_p8 = scmp.ne.s32.totalorder %s62_s20, %s99_s21  ;;  %p105_p10 = scmp.lt.s32.totalorder %s99_s21, %s99_s21 }
  0x17   :  { %v31_v10 = vrot.slane %v30_v7, 4 }
  0x18   :  { %v40_v11 = vrot.slane %v39_v9, 4  ;;  %p106_p11 = por %p105_p10, %p104_p9 }
  0x19   :  { %v32_v12 = vadd.f32 %v31_v10, %v30_v7 }
  0x1a   :  { %v41_v13 = vadd.f32 %v40_v11, %v39_v9  ;;  %p107_p12 = pnand %p106_p11, %p100_p8 }
  0x1b   :  { %v33_v14 = vrot.slane %v32_v12, 2 }
  0x1c   :  { %v42_v15 = vrot.slane %v41_v13, 2 }
  0x1d   :  { %v34_v16 = vadd.f32 %v33_v14, %v32_v12 }
  0x1e   :  { %v43_v17 = vadd.f32 %v42_v15, %v41_v13 }
  0x1f   :  { %v35_v18 = vrot.slane %v34_v16, 1 }
  0x20   :  { %v44_v19 = vrot.slane %v43_v17, 1 }
  0x21   :  { %v36_v20 = vadd.f32 %v35_v18, %v34_v16 }
  0x22   :  { %v45_v21 = vadd.f32 %v44_v19, %v43_v17 }
  0x23   :  { %v46_v22 = vmul.f32 0.0625, %v36_v20 }
  0x24   :  { %v47_v23 = vmul.f32 0.0625, %v45_v21 }
  0x25   :  { %v48_v24 = vsub.f32 %v23_v0, %v46_v22  ;;  %v49_v25 = vsub.f32 %v24_v1, %v46_v22 }
  0x26   :  { %v50_v26 = vsub.f32 %v25_v2, %v47_v23  ;;  %v51_v27 = vsub.f32 %v26_v5, %v47_v23 }
  0x27   :  { %52 = vst.msk [vmem:[#allocation5] sm:$0xff] %vm27_vm0, %v48_v24  ;;  %53 = vst.msk [vmem:[#allocation5 + $0x8] sm:$0xff] %vm27_vm0, %v49_v25 }
  0x28   :  { %54 = vst.msk [vmem:[#allocation5 + $0x10] sm:$0xff] %vm27_vm0, %v50_v26  ;;  %55 = vst.msk [vmem:[#allocation5 + $0x18] sm:$0xff] %vm27_vm0, %v51_v27 }
  0x29   :  { %110 = shalt.err (!%p107_p12)
}
  0x2a   :  { %s111_s24 = scalar_lea.hbm %s178_s1, 512 }
  0x2b   :  { %p112_p13 = scmp.ne.s32.totalorder %s178_s1, %s111_s24  ;;  %p115_p0 = scmp.lt.u32.totalorder %s111_s24, %s178_s1 }
  0x2d   :  { %p117_p1 = pnand %p115_p0, %p112_p13 }
  0x2f   :  { %120 = shalt.err (!%p117_p1)
}
  0x30   :  { %67 = dma.vmem_to_hbm [thread:$0]  %s62_s20, 512, %s178_s1, [#allocation4], %s126_s16, %s126_s16, %s127_s17  }
  0x31   :  { %123 = dma.done.wait [#allocation4], 512  }
  0x32   :  { %124 = vsyncadd [#allocation4], 4294966784 }
  0x33   :  { %71 = vsyncpa [#allocation3], 1 }
  0x34   :  { %72 = vsyncpa [#allocation4], 1 }

</bundles_post_ra>
